<compile_context>
chip_gen: v7x
topology: tpu7x:2x2x1
jax: 0.10.0
libtpu: 0.0.40
codegen_flags: <defaults>
</compile_context>

<pallas_src>
import functools
import math

import jax
import jax.numpy as jnp
from jax.experimental import pallas as pl
from jax.experimental.pallas import tpu as pltpu

_LANES = 128  # full vreg lane width -> unmasked full-width vld/vst


def symlog_kernel(x_ref, o_ref, *, inv_logbase):
    x = x_ref[...].astype(jnp.float32)                     # (tr, 128)
    ax = jnp.abs(x)
    # max(|x|,1) keeps log() in range for the untouched (|x|<=1) lanes and for
    # any garbage lanes of a clipped boundary block.
    y = jnp.log(jnp.maximum(ax, 1.0)) * inv_logbase + 1.0  # EUP log, VPU mul/add
    mapped = jnp.where(x > 0.0, y, -y)
    o_ref[...] = jnp.where(ax > 1.0, mapped, x).astype(o_ref.dtype)


def symlog_forward(x, base=2.718281828459045, *, tile_rows=4096):
    """Elementwise symlog with the same semantics as the torch module. Any shape."""
    if not jnp.issubdtype(x.dtype, jnp.floating):
        # TODO(synk): torch would raise on in-place log of integer tensors; we
        # require a floating dtype explicitly rather than silently truncating.
        raise TypeError(f"Symlog requires a floating dtype, got {x.dtype}")

    orig_shape = x.shape
    dtype = x.dtype
    inv_logbase = 1.0 / float(math.log(float(base)))

    flat = x.reshape(-1)
    n = flat.shape[0]
    if n == 0:
        return x

    itemsize = jnp.dtype(dtype).itemsize
    sublane = max(8, 32 // itemsize)  # 8 for f32, 16 for bf16, 32 for 8-bit

    # Only pad (and later slice) for the sub-128-element tail; the common case
    # (n % 128 == 0) is a pure reshape with no extra HBM round trips.
    padded = (n % _LANES) != 0
    if padded:
        n_pad = -(-n // _LANES) * _LANES
        flat = jnp.pad(flat, (0, n_pad - n))  # zeros map to themselves
    else:
        n_pad = n

    rows = n_pad // _LANES
    x2d = flat.reshape(rows, _LANES)

    # Row tile: single full-array block when it fits (always legal, regardless
    # of sublane divisibility), otherwise ~2 MiB (f32) sublane-aligned blocks
    # with a clipped ragged last block via pl.cdiv.
    if rows <= tile_rows:
        tr = rows
    else:
        tr = max(sublane, (tile_rows // sublane) * sublane)
    grid = pl.cdiv(rows, tr)

    cost = pl.CostEstimate(
        flops=6 * n,                       # abs/cmp/mul/add/neg/select
        transcendentals=n,                 # one log per element
        bytes_accessed=2 * n * itemsize,   # streaming read + write
    )

    out2d = pl.pallas_call(
        functools.partial(symlog_kernel, inv_logbase=inv_logbase),
        out_shape=jax.ShapeDtypeStruct((rows, _LANES), dtype),
        grid_spec=pltpu.PrefetchScalarGridSpec(
            num_scalar_prefetch=0,
            grid=(grid,),
            in_specs=[pl.BlockSpec((tr, _LANES), lambda i: (i, 0))],
            out_specs=pl.BlockSpec((tr, _LANES), lambda i: (i, 0)),
        ),
        compiler_params=pltpu.CompilerParams(
            dimension_semantics=("parallel",),
        ),
        cost_estimate=cost,
    )(x2d)

    flat_out = out2d.reshape(-1)
    if padded:
        flat_out = flat_out[:n]
    return flat_out.reshape(orig_shape)


if __name__ == "__main__":
    key = jax.random.PRNGKey(0)
    # Small shape; scaled so values land both inside and outside [-1, 1].
    x = 3.0 * jax.random.normal(key, (2, 4, 16, 16), dtype=jnp.float32)

    out = symlog_forward(x)
    out = jax.block_until_ready(out)

    # Pure-JAX reference: direct translation of the torch forward.
    logbase = jnp.log(jnp.float32(2.718281828459045))
    is_neg = x < -1
    is_pos = x > 1
    ref = x
    ref = jnp.where(is_neg, -(jnp.log(jnp.where(is_neg, -x, 1.0)) / logbase) - 1.0, ref)
    ref = jnp.where(is_pos, jnp.log(jnp.where(is_pos, x, 1.0)) / logbase + 1.0, ref)

    assert out.shape == x.shape
    assert out.dtype == x.dtype
    assert jnp.allclose(out, ref, atol=1e-5, rtol=1e-5)

    print("KERNEL_OK")
</pallas_src>

<mosaic_0001>
module attributes {stable_mosaic.version = 11 : i64} {
  func.func @symlog_kernel(%arg0: i32, %arg1: memref<16x128xf32, #tpu.memory_space<vmem>>, %arg2: memref<16x128xf32, #tpu.memory_space<vmem>>) attributes {dimension_semantics = [#tpu.dimension_semantics<parallel>], iteration_bounds = array<i64: 1>, scalar_prefetch = 0 : i64, scratch_operands = 0 : i64, tpu.core_type = #tpu.core_type<tc>, window_params = [{transform_indices = @transform_0, window_bounds = array<i64: 16, 128>}, {transform_indices = @transform_1, window_bounds = array<i64: 16, 128>}]} {
    %c0 = arith.constant 0 : index
    %c0_0 = arith.constant 0 : index
    %0 = vector.load %arg1[%c0, %c0_0] : memref<16x128xf32, #tpu.memory_space<vmem>>, vector<16x128xf32>
    %1 = math.absf %0 : vector<16x128xf32>
    %cst = arith.constant 1.000000e+00 : f32
    %2 = vector.broadcast %cst : f32 to vector<16x128xf32>
    %3 = arith.maximumf %1, %2 : vector<16x128xf32>
    %4 = math.log %3 : vector<16x128xf32>
    %cst_1 = arith.constant 1.000000e+00 : f32
    %5 = vector.broadcast %cst_1 : f32 to vector<16x128xf32>
    %6 = arith.mulf %4, %5 : vector<16x128xf32>
    %cst_2 = arith.constant 1.000000e+00 : f32
    %7 = vector.broadcast %cst_2 : f32 to vector<16x128xf32>
    %8 = arith.addf %6, %7 : vector<16x128xf32>
    %cst_3 = arith.constant 0.000000e+00 : f32
    %9 = vector.broadcast %cst_3 : f32 to vector<16x128xf32>
    %10 = arith.cmpf ogt, %0, %9 : vector<16x128xf32>
    %cst_4 = arith.constant 0.000000e+00 : f32
    %11 = vector.broadcast %cst_4 : f32 to vector<16x128xf32>
    %12 = arith.subf %11, %8 : vector<16x128xf32>
    %13 = arith.select %10, %8, %12 : vector<16x128xi1>, vector<16x128xf32>
    %cst_5 = arith.constant 1.000000e+00 : f32
    %14 = vector.broadcast %cst_5 : f32 to vector<16x128xf32>
    %15 = arith.cmpf ogt, %1, %14 : vector<16x128xf32>
    %16 = arith.select %15, %13, %0 : vector<16x128xi1>, vector<16x128xf32>
    %c0_6 = arith.constant 0 : index
    %c0_7 = arith.constant 0 : index
    %17 = vector.load %arg2[%c0_6, %c0_7] : memref<16x128xf32, #tpu.memory_space<vmem>>, vector<16x128xf32>
    tpu.vector_store %arg2[%c0_6, %c0_7], %16 {strides = array<i32>} : memref<16x128xf32, #tpu.memory_space<vmem>>, vector<16x128xf32>,
    return
  }
  func.func @transform_0(%arg0: i32) -> (i32, i32) {
    %c0_i32 = arith.constant 0 : i32
    %c0_i32_0 = arith.constant 0 : i32
    return %arg0, %c0_i32 : i32, i32
  }
  func.func @transform_1(%arg0: i32) -> (i32, i32) {
    %c0_i32 = arith.constant 0 : i32
    %c0_i32_0 = arith.constant 0 : i32
    return %arg0, %c0_i32 : i32, i32
  }
}

</mosaic_0001>

<bundles_post_ra>
// kernel: tpu_custom_call.1
= control target key start
LH: loop header
LB: loop body
LE: loop exit
PB: predicated region body
PF: predicated region fallthrough
CT: control target
= control target key end

     0   :  { %6 = vsyncpa [#allocation3], 0  ;;  %s164_s0 = inlined_call_operand.hbm [shape: f32[16,128], index: 0, kind: input, shape index: {}]   ;;  %s165_s1 = inlined_call_operand.hbm [shape: f32[16,128], index: 1, kind: output, shape index: {}]  }
   0x1   :  { %7 = vsyncpa [#allocation4], 0  ;;  %s120_s6 = smov [#allocation2]   ;;  %s72_s10 = scalar_lea.hbm %s164_s0, 256 }
   0x2   :  { %s13_s7 = sshll.u32 %s120_s6, 4  ;;  %p73_p0 = scmp.ne.s32.totalorder %s164_s0, %s72_s10  ;;  %s14_s7 = int_to_ptr.vmem [resolvable:$true] %s13_s7 }
   0x3   :  { %p76_p1 = scmp.lt.u32.totalorder %s72_s10, %s164_s0 }
   0x5   :  { %p78_p2 = pnand %p76_p1, %p73_p0 }
   0x7   :  { %81 = shalt.err (!%p78_p2)
}
   0x8   :  { %s82_s15 = scalar_lea.vmem %s14_s7, 256  ;;  %p87_p4 = scmp.lt.s32.totalorder %s14_s7, %s14_s7 }
   0x9   :  { %p83_p3 = scmp.ne.s32.totalorder %s14_s7, %s82_s15  ;;  %p88_p5 = scmp.lt.s32.totalorder %s82_s15, %s82_s15 }
   0xb   :  { %p89_p6 = por %p88_p5, %p87_p4 }
   0xd   :  { %p90_p7 = pnand %p89_p6, %p83_p3 }
   0xf   :  { %93 = shalt.err (!%p90_p7)
}
  0x10   :  { %s121_s16 = smov 128   ;;  %s122_s17 = smov 8  }
  0x11   :  { %19 = dma.hbm_to_vmem [thread:$0]  %s164_s0, 256, %s14_s7, [#allocation3], %s121_s16, %s121_s16, %s122_s17  }
  0x12   :  { %116 = dma.done.wait [#allocation3], 256  }
  0x13   :  { %117 = vsyncadd [#allocation3], 4294967040  ;;  %v23_v0 = vld [vmem:[#allocation2] sm:$0xff]  ;;  %v24_v1 = vld [vmem:[#allocation2 + $0x8] sm:$0xff]  ;;  %s123_s0 = smov [#allocation5]  }
  0x14   :  { %v25_v2 = vand.u32 2147483647, %v23_v0  ;;  %v26_v3 = vand.u32 2147483647, %v24_v1  ;;  %vm35_vm0 = vcmp.gt.f32.partialorder %v23_v0, 0.0  ;;  %vm36_vm2 = vcmp.gt.f32.partialorder %v24_v1, 0.0 }
  0x15   :  { %s52_s20 = sshll.u32 %s123_s0, 4  ;;  %s53_s20 = int_to_ptr.vmem [resolvable:$true] %s52_s20 }
  0x16   :  { %v27_v4 = vmax.f32 %v25_v2, 1.0  ;;  %v28_v5 = vmax.f32 %v26_v3, 1.0  ;;  %vm41_vm1 = vcmp.gt.f32.partialorder %v25_v2, 1.0  ;;  %vm42_vm3 = vcmp.gt.f32.partialorder %v26_v3, 1.0  ;;  %s94_s21 = scalar_lea.vmem %s53_s20, 256  ;;  %p99_p9 = scmp.lt.s32.totalorder %s53_s20, %s53_s20 }
  0x17   :  { %p95_p8 = scmp.ne.s32.totalorder %s53_s20, %s94_s21  ;;  %p100_p10 = scmp.lt.s32.totalorder %s94_s21, %s94_s21 }
  0x18   :  { %68 = vlog2.f32 %v27_v4 }
  0x19   :  { %70 = vlog2.f32 %v28_v5  ;;  %p101_p11 = por %p100_p10, %p99_p9 }
  0x1b   :  { %p102_p12 = pnand %p101_p11, %p95_p8 }
  0x22   :  { %v69_v6 = vpop.eup %68 }
  0x23   :  { %v71_v7 = vpop.eup %70  ;;  %v30_v8 = vmul.f32 0.6931472, %v69_v6 }
  0x24   :  { %v32_v9 = vmul.f32 0.6931472, %v71_v7 }
  0x25   :  { %v33_v10 = vadd.f32 1.0, %v30_v8 }
  0x26   :  { %v34_v11 = vadd.f32 1.0, %v32_v9 }
  0x27   :  { %v37_v12 = vsub.f32 0.0, %v33_v10 }
  0x28   :  { %v38_v13 = vsub.f32 0.0, %v34_v11 }
  0x29   :  { %v39_v14 = vsel %vm35_vm0, %v33_v10, %v37_v12 }
  0x2a   :  { %v43_v15 = vsel %vm41_vm1, %v39_v14, %v23_v0  ;;  %v40_v16 = vsel %vm36_vm2, %v34_v11, %v38_v13 }
  0x2b   :  { %45 = vst [vmem:[#allocation5] sm:$0xff] %v43_v15  ;;  %v44_v17 = vsel %vm42_vm3, %v40_v16, %v24_v1 }
  0x2c   :  { %46 = vst [vmem:[#allocation5 + $0x8] sm:$0xff] %v44_v17 }
  0x2d   :  { %105 = shalt.err (!%p102_p12)
}
  0x2e   :  { %s106_s24 = scalar_lea.hbm %s165_s1, 256 }
  0x2f   :  { %p107_p13 = scmp.ne.s32.totalorder %s165_s1, %s106_s24  ;;  %p110_p0 = scmp.lt.u32.totalorder %s106_s24, %s165_s1 }
  0x31   :  { %p112_p1 = pnand %p110_p0, %p107_p13 }
  0x33   :  { %115 = shalt.err (!%p112_p1)
}
  0x34   :  { %58 = dma.vmem_to_hbm [thread:$0]  %s53_s20, 256, %s165_s1, [#allocation4], %s121_s16, %s121_s16, %s122_s17  }
  0x35   :  { %118 = dma.done.wait [#allocation4], 256  }
  0x36   :  { %119 = vsyncadd [#allocation4], 4294967040 }
  0x37   :  { %62 = vsyncpa [#allocation3], 1 }
  0x38   :  { %63 = vsyncpa [#allocation4], 1 }

</bundles_post_ra>
